<compile_context>
chip_gen: v6e
topology: v6e:2x2x1
jax: 0.10.0
libtpu: 0.0.40
codegen_flags: <defaults>
</compile_context>

<pallas_src>
import jax
import jax.numpy as jnp
from jax.experimental import pallas as pl
from jax.experimental.pallas import tpu as pltpu


def tree_attention_kernel(hid_ref, enc_ref, mask_ref,
                          wh_t_ref, we_t_ref, ba_ref, ws_ref,
                          out_ref):
    # enc_ref : (S, TB, E)  native [S, B, E] layout, batch-tiled
    # hid_ref : (TB, H)     mask_ref: (S, TB)     out_ref: (S, TB)
    # wh_t_ref: (H, H)      we_t_ref: (E, H)      ba_ref / ws_ref: (1, H)
    S, TB, E = enc_ref.shape
    H = wh_t_ref.shape[1]

    # Hidden projection with b_attn folded in (computed once per batch tile).
    hproj = jnp.dot(hid_ref[...], wh_t_ref[...],
                    preferred_element_type=jnp.float32) + ba_ref[...]       # (TB, H)

    # Encoder projection as a single (S*TB, E) @ (E, H) matmul.  The flatten
    # is a free sublane regroup when TB % 8 == 0 (tiled path); for the tiny
    # TB == B < 8 path it is a small VMEM relayout (negligible).
    eproj = jnp.dot(enc_ref[...].reshape(S * TB, E), we_t_ref[...],
                    preferred_element_type=jnp.float32)                     # (S*TB, H)

    feat = jnp.tanh(eproj.reshape(S, TB, H) + hproj[None, :, :])            # (S, TB, H)

    # score Linear(H -> 1) as VPU multiply + lane reduction (no N=1 matmul).
    # b_score is omitted: a constant shift is invariant under softmax.
    scores = jnp.sum(feat * ws_ref[...][None, :, :], axis=-1)               # (S, TB)

    # masked_fill(seq_mask, -1e12)
    scores = jnp.where(mask_ref[...] != 0.0, jnp.float32(-1e12), scores)

    # softmax over the sequence (sublane) axis; batch columns are independent.
    m = jnp.max(scores, axis=0, keepdims=True)                              # (1, TB)
    ez = jnp.exp(scores - m)
    denom = jnp.sum(ez, axis=0, keepdims=True)
    out_ref[...] = ez * pl.reciprocal(denom, approx=False)


def _vmem_capacity_bytes():
    try:
        info = pltpu.get_tpu_info()
        cap = getattr(info, "vmem_capacity_bytes", None)
        if cap:
            return int(cap)
    except Exception:
        pass
    return 64 * 1024 * 1024  # conservative fallback (v7x per-core physical VMEM)


def _choose_batch_tile(B, S, E, H, budget_bytes):
    """Largest batch tile whose working set fits the VMEM budget."""
    weights = 4 * (H * H + E * H + 2 * H)                 # resident weights
    # double-buffered enc block + possible relayout copy + f32 intermediates
    per_row = 4 * (3 * S * E + 2 * S * H + 8 * S + 4 * H)
    fit = max(1, (budget_bytes - weights) // per_row)
    if B <= fit:
        if B >= 256:
            # plenty of rows: split into 2 grid steps so both v7x TCs get work
            half = (B + 1) // 2
            return ((half + 127) // 128) * 128
        return B                                          # whole batch, one step
    if fit >= 128:
        return (fit // 128) * 128                         # lane-dense mask/out blocks
    return max(8, (fit // 8) * 8)                         # sublane-aligned tile


def tree_attention(hidden, encoder_outputs, seq_mask,
                   w_attn, b_attn, w_score, b_score,
                   input_size, hidden_size):
    """hidden [1,B,H], encoder_outputs [S,B,E], seq_mask [B,S] -> [B,1,S]."""
    S, B, E = encoder_outputs.shape
    H = hidden_size
    assert E == input_size and hidden.shape == (1, B, H)
    del b_score  # softmax-invariant constant; intentionally not used in-kernel.

    if seq_mask is None:
        seq_mask = jnp.zeros((B, S), dtype=jnp.float32)

    # Only tiny arrays are rearranged in the wrapper; encoder_outputs stays
    # in its native [S, B, E] layout (no extra HBM pass over the big tensor).
    hid_b = hidden[0]                                      # (B, H)
    mask_t = jnp.transpose(seq_mask.astype(jnp.float32))   # (S, B)  tiny
    wh_t = jnp.transpose(w_attn[:, :H])                    # (H, H)
    we_t = jnp.transpose(w_attn[:, H:])                    # (E, H)
    ba = b_attn.reshape(1, H)                              # (1, H)
    ws = w_score.reshape(1, H)                             # (1, H)

    cap = _vmem_capacity_bytes()
    TB = min(_choose_batch_tile(B, S, E, H, cap // 4), B)
    num_tiles = pl.cdiv(B, TB)

    # Invariant weights: whole-array VMEM residents (no per-step double-buffering).
    vmem_full = pl.BlockSpec(memory_space=pltpu.MemorySpace.VMEM)

    out_sb = pl.pallas_call(
        tree_attention_kernel,
        out_shape=jax.ShapeDtypeStruct((S, B), jnp.float32),
        grid_spec=pltpu.PrefetchScalarGridSpec(
            num_scalar_prefetch=0,
            grid=(num_tiles,),
            in_specs=[
                pl.BlockSpec((TB, H), lambda b: (b, 0)),          # hidden
                pl.BlockSpec((S, TB, E), lambda b: (0, b, 0)),    # enc, native layout
                pl.BlockSpec((S, TB), lambda b: (0, b)),          # mask (seq-major)
                vmem_full,                                        # wh_t
                vmem_full,                                        # we_t
                vmem_full,                                        # ba
                vmem_full,                                        # ws
            ],
            out_specs=pl.BlockSpec((S, TB), lambda b: (0, b)),
        ),
        compiler_params=pltpu.CompilerParams(
            dimension_semantics=("parallel",),
            vmem_limit_bytes=int(cap // 2)),
    )(hid_b, encoder_outputs, mask_t, wh_t, we_t, ba, ws)

    # Tiny (S, B) -> (B, 1, S) rearrangement; negligible vs the enc stream.
    return jnp.transpose(out_sb)[:, None, :]


def tree_attention_ref(hidden, encoder_outputs, seq_mask,
                       w_attn, b_attn, w_score, b_score):
    """Pure-JAX reference mirroring the PyTorch forward."""
    S, B, E = encoder_outputs.shape
    H = hidden.shape[-1]
    hid_rep = jnp.repeat(hidden, S, axis=0)                          # (S, B, H)
    energy_in = jnp.concatenate([hid_rep, encoder_outputs], axis=2)  # (S, B, H+E)
    energy_in = energy_in.reshape(-1, H + E)
    feat = jnp.tanh(energy_in @ w_attn.T + b_attn)
    attn_energies = (feat @ w_score.T + b_score)[:, 0]
    attn_energies = attn_energies.reshape(S, B).T                    # (B, S)
    attn_energies = jnp.where(seq_mask.astype(bool), -1e12, attn_energies)
    attn_energies = jax.nn.softmax(attn_energies, axis=1)
    return attn_energies[:, None, :]                                 # (B, 1, S)


if __name__ == "__main__":
    input_size = 32   # E (encoder output dim)
    hidden_size = 32  # H
    B, S = 2, 8

    key = jax.random.PRNGKey(0)
    k1, k2, k3, k4, k5, k6 = jax.random.split(key, 6)

    hidden = jax.random.normal(k1, (1, B, hidden_size), dtype=jnp.float32)
    encoder_outputs = jax.random.normal(k2, (S, B, input_size), dtype=jnp.float32)
    # deterministic mask: mask out the last two positions of batch element 1
    seq_mask = jnp.zeros((B, S), dtype=jnp.float32).at[1, S - 2:].set(1.0)

    # deterministic "nn.Linear"-style parameters (synthetic, not a checkpoint)
    bound_a = 1.0 / jnp.sqrt(hidden_size + input_size)
    w_attn = jax.random.uniform(k3, (hidden_size, hidden_size + input_size),
                                minval=-bound_a, maxval=bound_a, dtype=jnp.float32)
    b_attn = jax.random.uniform(k4, (hidden_size,),
                                minval=-bound_a, maxval=bound_a, dtype=jnp.float32)
    bound_s = 1.0 / jnp.sqrt(hidden_size)
    w_score = jax.random.uniform(k5, (1, hidden_size),
                                 minval=-bound_s, maxval=bound_s, dtype=jnp.float32)
    b_score = jax.random.uniform(k6, (1,),
                                 minval=-bound_s, maxval=bound_s, dtype=jnp.float32)

    out = tree_attention(hidden, encoder_outputs, seq_mask,
                         w_attn, b_attn, w_score, b_score,
                         input_size, hidden_size)
    out = jax.block_until_ready(out)

    ref = tree_attention_ref(hidden, encoder_outputs, seq_mask,
                             w_attn, b_attn, w_score, b_score)
    assert out.shape == (B, 1, S)
    assert jnp.allclose(out, ref, atol=1e-5, rtol=1e-5), "mismatch vs reference"
    print("KERNEL_OK")
</pallas_src>

<mosaic_0001>
module attributes {stable_mosaic.version = 11 : i64} {
  func.func @tree_attention_kernel(%arg0: i32, %arg1: memref<2x32xf32, #tpu.memory_space<vmem>>, %arg2: memref<8x2x32xf32, #tpu.memory_space<vmem>>, %arg3: memref<8x2xf32, #tpu.memory_space<vmem>>, %arg4: memref<32x32xf32, #tpu.memory_space<vmem>>, %arg5: memref<32x32xf32, #tpu.memory_space<vmem>>, %arg6: memref<1x32xf32, #tpu.memory_space<vmem>>, %arg7: memref<1x32xf32, #tpu.memory_space<vmem>>, %arg8: memref<8x2xf32, #tpu.memory_space<vmem>>) attributes {dimension_semantics = [#tpu.dimension_semantics<parallel>], iteration_bounds = array<i64: 1>, scalar_prefetch = 0 : i64, scratch_operands = 0 : i64, tpu.core_type = #tpu.core_type<tc>, window_params = [{transform_indices = @transform_0, window_bounds = array<i64: 2, 32>}, {transform_indices = @transform_1, window_bounds = array<i64: 8, 2, 32>}, {transform_indices = @transform_2, window_bounds = array<i64: 8, 2>}, {pipeline_mode = #tpu.pipeline_mode<synchronous>, transform_indices = @transform_3, window_bounds = array<i64: 32, 32>}, {pipeline_mode = #tpu.pipeline_mode<synchronous>, transform_indices = @transform_4, window_bounds = array<i64: 32, 32>}, {pipeline_mode = #tpu.pipeline_mode<synchronous>, transform_indices = @transform_5, window_bounds = array<i64: 1, 32>}, {pipeline_mode = #tpu.pipeline_mode<synchronous>, transform_indices = @transform_6, window_bounds = array<i64: 1, 32>}, {transform_indices = @transform_7, window_bounds = array<i64: 8, 2>}]} {
    %c0 = arith.constant 0 : index
    %c0_0 = arith.constant 0 : index
    %0 = vector.load %arg1[%c0, %c0_0] : memref<2x32xf32, #tpu.memory_space<vmem>>, vector<2x32xf32>
    %c0_1 = arith.constant 0 : index
    %c0_2 = arith.constant 0 : index
    %1 = vector.load %arg4[%c0_1, %c0_2] : memref<32x32xf32, #tpu.memory_space<vmem>>, vector<32x32xf32>
    %cst = arith.constant dense<0.000000e+00> : vector<2x32xf32>
    %2 = tpu.matmul %0, %1, %cst {dimension_numbers = #tpu.dot_dimension_numbers<[1], [0], [0], [1], [0, 0, 1, 1], [], []>} : vector<2x32xf32>, vector<32x32xf32>, vector<2x32xf32> -> vector<2x32xf32>
    %c0_3 = arith.constant 0 : index
    %c0_4 = arith.constant 0 : index
    %3 = vector.load %arg6[%c0_3, %c0_4] : memref<1x32xf32, #tpu.memory_space<vmem>>, vector<1x32xf32>
    %4 = vector.broadcast %3 : vector<1x32xf32> to vector<2x32xf32>
    %5 = arith.addf %2, %4 : vector<2x32xf32>
    %c0_5 = arith.constant 0 : index
    %c0_6 = arith.constant 0 : index
    %c0_7 = arith.constant 0 : index
    %6 = vector.load %arg2[%c0_5, %c0_6, %c0_7] : memref<8x2x32xf32, #tpu.memory_space<vmem>>, vector<8x2x32xf32>
    %7 = vector.shape_cast %6 : vector<8x2x32xf32> to vector<16x32xf32>
    %c0_8 = arith.constant 0 : index
    %c0_9 = arith.constant 0 : index
    %8 = vector.load %arg5[%c0_8, %c0_9] : memref<32x32xf32, #tpu.memory_space<vmem>>, vector<32x32xf32>
    %cst_10 = arith.constant dense<0.000000e+00> : vector<16x32xf32>
    %9 = tpu.matmul %7, %8, %cst_10 {dimension_numbers = #tpu.dot_dimension_numbers<[1], [0], [0], [1], [0, 0, 1, 1], [], []>} : vector<16x32xf32>, vector<32x32xf32>, vector<16x32xf32> -> vector<16x32xf32>
    %10 = vector.shape_cast %9 : vector<16x32xf32> to vector<8x2x32xf32>
    %11 = vector.shape_cast %5 : vector<2x32xf32> to vector<1x2x32xf32>
    %12 = vector.broadcast %11 : vector<1x2x32xf32> to vector<8x2x32xf32>
    %13 = arith.addf %10, %12 : vector<8x2x32xf32>
    %14 = math.tanh %13 : vector<8x2x32xf32>
    %c0_11 = arith.constant 0 : index
    %c0_12 = arith.constant 0 : index
    %15 = vector.load %arg7[%c0_11, %c0_12] : memref<1x32xf32, #tpu.memory_space<vmem>>, vector<1x32xf32>
    %16 = vector.shape_cast %15 : vector<1x32xf32> to vector<1x1x32xf32>
    %17 = vector.broadcast %16 : vector<1x1x32xf32> to vector<8x2x32xf32>
    %18 = arith.mulf %14, %17 : vector<8x2x32xf32>
    %cst_13 = arith.constant dense<0.000000e+00> : vector<8x2xf32>
    %19 = vector.multi_reduction <add>, %18, %cst_13 [2] : vector<8x2x32xf32> to vector<8x2xf32>
    %c0_14 = arith.constant 0 : index
    %c0_15 = arith.constant 0 : index
    %20 = vector.load %arg3[%c0_14, %c0_15] : memref<8x2xf32, #tpu.memory_space<vmem>>, vector<8x2xf32>
    %cst_16 = arith.constant 0.000000e+00 : f32
    %21 = vector.broadcast %cst_16 : f32 to vector<8x2xf32>
    %22 = arith.cmpf one, %20, %21 : vector<8x2xf32>
    %cst_17 = arith.constant -9.99999995E+11 : f32
    %23 = vector.broadcast %cst_17 : f32 to vector<8x2xf32>
    %24 = arith.select %22, %23, %19 : vector<8x2xi1>, vector<8x2xf32>
    %cst_18 = arith.constant dense<0xFF800000> : vector<2xf32>
    %25 = vector.multi_reduction <maximumf>, %24, %cst_18 [0] : vector<8x2xf32> to vector<2xf32>
    %26 = vector.shape_cast %25 : vector<2xf32> to vector<1x2xf32>
    %27 = vector.broadcast %26 : vector<1x2xf32> to vector<8x2xf32>
    %28 = arith.subf %24, %27 : vector<8x2xf32>
    %29 = math.exp %28 : vector<8x2xf32>
    %cst_19 = arith.constant dense<0.000000e+00> : vector<2xf32>
    %30 = vector.multi_reduction <add>, %29, %cst_19 [0] : vector<8x2xf32> to vector<2xf32>
    %31 = vector.shape_cast %30 : vector<2xf32> to vector<1x2xf32>
    %32 = tpu.reciprocal %31 : vector<1x2xf32> -> vector<1x2xf32>
    %33 = vector.broadcast %32 : vector<1x2xf32> to vector<8x2xf32>
    %34 = arith.mulf %29, %33 : vector<8x2xf32>
    %c0_20 = arith.constant 0 : index
    %c0_21 = arith.constant 0 : index
    %35 = vector.load %arg8[%c0_20, %c0_21] : memref<8x2xf32, #tpu.memory_space<vmem>>, vector<8x2xf32>
    tpu.vector_store %arg8[%c0_20, %c0_21], %34 {strides = array<i32>} : memref<8x2xf32, #tpu.memory_space<vmem>>, vector<8x2xf32>,
    return
  }
  func.func @transform_0(%arg0: i32) -> (i32, i32) {
    %c0_i32 = arith.constant 0 : i32
    %c0_i32_0 = arith.constant 0 : i32
    return %arg0, %c0_i32 : i32, i32
  }
  func.func @transform_1(%arg0: i32) -> (i32, i32, i32) {
    %c0_i32 = arith.constant 0 : i32
    %c0_i32_0 = arith.constant 0 : i32
    %c0_i32_1 = arith.constant 0 : i32
    return %c0_i32, %arg0, %c0_i32_0 : i32, i32, i32
  }
  func.func @transform_2(%arg0: i32) -> (i32, i32) {
    %c0_i32 = arith.constant 0 : i32
    %c0_i32_0 = arith.constant 0 : i32
    return %c0_i32, %arg0 : i32, i32
  }
  func.func @transform_3(%arg0: i32) -> (i32, i32) {
    %c0_i32 = arith.constant 0 : i32
    %c0_i32_0 = arith.constant 0 : i32
    %c0_i32_1 = arith.constant 0 : i32
    return %c0_i32, %c0_i32_0 : i32, i32
  }
  func.func @transform_4(%arg0: i32) -> (i32, i32) {
    %c0_i32 = arith.constant 0 : i32
    %c0_i32_0 = arith.constant 0 : i32
    %c0_i32_1 = arith.constant 0 : i32
    return %c0_i32, %c0_i32_0 : i32, i32
  }
  func.func @transform_5(%arg0: i32) -> (i32, i32) {
    %c0_i32 = arith.constant 0 : i32
    %c0_i32_0 = arith.constant 0 : i32
    %c0_i32_1 = arith.constant 0 : i32
    return %c0_i32, %c0_i32_0 : i32, i32
  }
  func.func @transform_6(%arg0: i32) -> (i32, i32) {
    %c0_i32 = arith.constant 0 : i32
    %c0_i32_0 = arith.constant 0 : i32
    %c0_i32_1 = arith.constant 0 : i32
    return %c0_i32, %c0_i32_0 : i32, i32
  }
  func.func @transform_7(%arg0: i32) -> (i32, i32) {
    %c0_i32 = arith.constant 0 : i32
    %c0_i32_0 = arith.constant 0 : i32
    return %c0_i32, %arg0 : i32, i32
  }
}

</mosaic_0001>

<bundles_post_ra>
// kernel: tpu_custom_call.1
= control target key start
LH: loop header
LB: loop body
LE: loop exit
PB: predicated region body
PF: predicated region fallthrough
CT: control target
= control target key end

     0   :  { %12 = vsyncpa [#allocation3], 0  ;;  %s699_s0 = inlined_call_operand.vmem [shape: f32[2,32], index: 0, kind: input, shape index: {}]   ;;  %s700_s1 = inlined_call_operand.hbm [shape: f32[8,2,32], index: 1, kind: input, shape index: {}]   ;;  %s701_s2 = inlined_call_operand.vmem [shape: f32[8,2], index: 2, kind: input, shape index: {}]   ;;  %s702_s3 = inlined_call_operand.hbm [shape: f32[32,32], index: 3, kind: input, shape index: {}]   ;;  %s703_s4 = inlined_call_operand.hbm [shape: f32[32,32], index: 4, kind: input, shape index: {}]   ;;  %s704_s5 = inlined_call_operand.vmem [shape: f32[1,32], index: 5, kind: input, shape index: {}]   ;;  %s705_s6 = inlined_call_operand.vmem [shape: f32[1,32], index: 6, kind: input, shape index: {}]   ;;  %s706_s7 = inlined_call_operand.vmem [shape: f32[8,2], index: 7, kind: output, shape index: {}]  }
   0x1   :  { %13 = vsyncpa [#allocation5], 0  ;;  %s605_s24 = smov [#allocation4]  }
   0x2   :  { %s35_s25 = sshll.u32 %s605_s24, 4  ;;  %s36_s25 = int_to_ptr.vmem [resolvable:$true] %s35_s25 }
   0x3   :  { %s549_s26 = scalar_lea.vmem %s36_s25, 512  ;;  %p554_p1 = scmp.lt.s32.totalorder %s36_s25, %s36_s25 }
   0x4   :  { %p550_p0 = scmp.ne.s32.totalorder %s36_s25, %s549_s26  ;;  %p555_p2 = scmp.lt.s32.totalorder %s549_s26, %s549_s26 }
   0x6   :  { %p556_p3 = por %p555_p2, %p554_p1 }
   0x8   :  { %p557_p4 = pnand %p556_p3, %p550_p0 }
   0xa   :  { %560 = shalt.err (!%p557_p4)
}
   0xb   :  { %s606_s27 = smov 128   ;;  %s607_s28 = smov 8  }
   0xc   :  { %41 = dma.hbm_to_vmem [thread:$0]  %s702_s3, 512, %s36_s25, [#allocation5], %s606_s27, %s606_s27, %s607_s28  }
   0xd   :  { %s608_s8 = smov [#allocation2]  }
   0xe   :  { %s21_s9 = sshll.u32 %s608_s8, 4  ;;  %s22_s9 = int_to_ptr.vmem [resolvable:$true] %s21_s9 }
   0xf   :  { %s569_s10 = scalar_lea.vmem %s22_s9, 256  ;;  %p574_p6 = scmp.lt.s32.totalorder %s22_s9, %s22_s9 }
  0x10   :  { %p570_p5 = scmp.ne.s32.totalorder %s22_s9, %s569_s10  ;;  %p575_p7 = scmp.lt.s32.totalorder %s569_s10, %s569_s10 }
  0x12   :  { %p576_p8 = por %p575_p7, %p574_p6 }
  0x14   :  { %p577_p9 = pnand %p576_p8, %p570_p5 }
  0x16   :  { %580 = shalt.err (!%p577_p9)
}
  0x17   :  { %s609_s11 = smov 32   ;;  %s610_s12 = smov 2  }
  0x18   :  { %27 = dma.hbm_to_vmem [thread:$0]  %s700_s1, 256, %s22_s9, [#allocation3], %s609_s11, %s609_s11, %s610_s12  }
  0x19   :  { %s611_s15 = smov [#allocation6]  }
  0x1a   :  { %s47_s16 = sshll.u32 %s611_s15, 4  ;;  %s48_s16 = int_to_ptr.vmem [resolvable:$true] %s47_s16 }
  0x1b   :  { %s589_s3 = scalar_lea.vmem %s48_s16, 512  ;;  %p594_p11 = scmp.lt.s32.totalorder %s48_s16, %s48_s16 }
  0x1c   :  { %p590_p10 = scmp.ne.s32.totalorder %s48_s16, %s589_s3  ;;  %p595_p12 = scmp.lt.s32.totalorder %s589_s3, %s589_s3 }
  0x1e   :  { %p596_p13 = por %p595_p12, %p594_p11 }
  0x20   :  { %p597_p0 = pnand %p596_p13, %p590_p10 }
  0x22   :  { %600 = shalt.err (!%p597_p0)
}
  0x23   :  { %53 = dma.hbm_to_vmem [thread:$0]  %s703_s4, 512, %s48_s16, [#allocation5], %s606_s27, %s606_s27, %s607_s28  }
  0x24   :  { %601 = dma.done.wait [#allocation3], 256  }
  0x25   :  { %602 = vsyncadd [#allocation3], 4294967040 }
  0x26   :  { %603 = dma.done.wait [#allocation5], 1024  }
  0x27   :  { %604 = vsyncadd [#allocation5], 4294966272  ;;  %v612_v0 = vmov 0.0   ;;  %vm613_vm0 = vmmov 0   ;;  %v178_v1 = vlaneseq  ;;  %v614_v2 = vmov 1983009808  }
  0x28   :  { %489 = vmatprep.subr.mxu0 %v612_v0  ;;  %497 = vmatprep.mubr.msk.f32.mxu0 %vm613_vm0, %v612_v0  ;;  %v176_v3 = vunpack.c.l.s4 %v614_v2  ;;  %v164_v6 = vld [vmem:[#allocation6 + $0x18] sm:$0xff]  ;;  %v163_v8 = vld [vmem:[#allocation6 + $0x10] sm:$0xff]  ;;  %v162_v10 = vld [vmem:[#allocation6 + $0x8] sm:$0xff]  ;;  %vm79_vm1 = vcmask 261120   ;;  %vm361_vm2 = vcmask 254976   ;;  %vm430_vm3 = vcmask 1041409  }
  0x29   :  { %v665_v5 = vshrl.u32 %v178_v1, 7  ;;  %v71_v7 = vld [vmem:[#allocation4 + $0x18] sm:$0xff]  ;;  %500 = vmatprep.subr.mxu1 %v164_v6  ;;  %v70_v9 = vld [vmem:[#allocation4 + $0x10] sm:$0xff]  ;;  %v69_v11 = vld [vmem:[#allocation4 + $0x8] sm:$0xff]  ;;  %vm432_vm4 = vcmask 1042434   ;;  %vm434_vm5 = vcmask 1043459  }
  0x2a   :  { %v177_v4 = vunpack.c.0.s8 %v176_v3  ;;  %490 = vmatpush3.msra.mxu0 %v71_v7  ;;  %501 = vmatpush3.msra.mxu1 %v164_v6  ;;  %v161_v12 = vld [vmem:[#allocation6] sm:$0xff]  ;;  %v153_v13 = vld [vmem:[#allocation2] sm:$0x3]  ;;  %v154_v15 = vld [vmem:[#allocation2 + $0x2] sm:$0x3]  ;;  %vm436_vm6 = vcmask 1044484  }
  0x2b   :  { %491 = vmatprep.subr.mxu0 %v612_v0  ;;  %502 = vmatprep.subr.mxu1 %v163_v8  ;;  %v155_v16 = vld [vmem:[#allocation2 + $0x4] sm:$0x3]  ;;  %v156_v17 = vld [vmem:[#allocation2 + $0x6] sm:$0x3]  ;;  %v68_v18 = vld [vmem:[#allocation4] sm:$0xff]  ;;  %v173_v19 = vcombine.low %v153_v13, %v154_v15  ;;  %vm438_vm7 = vcmask 1045509  }
  0x2c   :  { %v180_v14 = vsub.s32 %v177_v4, %v665_v5  ;;  %492 = vmatpush3.msra.mxu0 %v70_v9  ;;  %503 = vmatpush3.msra.mxu1 %v163_v8  ;;  %v174_v20 = vcombine.low %v155_v16, %v156_v17  ;;  %v157_v21 = vld [vmem:[#allocation2 + $0x8] sm:$0x3]  ;;  %v158_v22 = vld [vmem:[#allocation2 + $0xa] sm:$0x3]  ;;  %v67_v23 = vld [vmem:[%s699_s0] sm:$0x3] }
  0x2d   :  { %493 = vmatprep.subr.mxu0 %v612_v0  ;;  %504 = vmatprep.subr.mxu1 %v162_v10  ;;  %v159_v24 = vld [vmem:[#allocation2 + $0xc] sm:$0x3]  ;;  %v160_v25 = vld [vmem:[#allocation2 + $0xe] sm:$0x3]  ;;  %v190_v26 = vcombine.low %v157_v21, %v158_v22  ;;  %v473_v36 = vld [vmem:[%s704_s5] ss:$0 sm:$0xff] }
  0x2e   :  { %494 = vmatpush3.msra.mxu0 %v69_v11  ;;  %505 = vmatpush3.msra.mxu1 %v162_v10  ;;  %v181_v27 = vrot.slane %v173_v19, %v180_v14  ;;  %v188_v28 = vrot.slane %v174_v20, %v180_v14  ;;  %v191_v29 = vcombine.low %v159_v24, %v160_v25  ;;  %v477_v59 = vld [vmem:[%s705_s6] ss:$0 sm:$0xff]  ;;  %v397_v21 = vand.u32 127, %v178_v1 }
  0x2f   :  { %495 = vmatprep.subr.mxu0 %v612_v0  ;;  %506 = vmatprep.subr.mxu1 %v161_v12  ;;  %v198_v30 = vrot.slane %v190_v26, %v180_v14  ;;  %vm440_vm8 = vcmask 1046534   ;;  %vm442_vm9 = vcmask 1047559   ;;  %vm446_vm11 = vcmask 15360  }
  0x30   :  { %496 = vmatpush3.msra.mxu0 %v68_v18  ;;  %507 = vmatpush3.msra.mxu1 %v161_v12  ;;  %v189_v31 = vcombine.low %v181_v27, %v188_v28  ;;  %v205_v32 = vrot.slane %v191_v29, %v180_v14  ;;  %v400_v24 = vsub.s32 %v397_v21, %v665_v5 }
  0x31   :  { %498 = vmatmul.mubr.msk.f32.vlgmr.msra.gmra.mxu0 %vm79_vm1, %v67_v23 }
  0x32   :  { %508 = vmatprep.mubr.msk.f32.mxu1 %vm79_vm1, %v189_v31  ;;  %v206_v33 = vcombine.low %v198_v30, %v205_v32 }
  0x34   :  { %509 = vmatmul.mubr.msk.f32.vlgmr.msra.gmra.mxu1 %vm79_vm1, %v206_v33 }
  0xf1   :  { %v149_v34 = vpop.f32.mrf.mxu0 }
  0xf2   :  { %v150_v41 = vadd.f32 %v473_v36, %v149_v34 }
  0xf3   :  { %v499_v35 = vpop.f32.mrf.mxu0 }
  0xf4   :  { %v510_v37 = vpop.f32.mrf.mxu1 }
  0xf5   :  { %v305_v38 = vcombine.high %v510_v37, %v510_v37  ;;  %v312_v39 = vrot.slane %v510_v37, %v180_v14 }
  0xf6   :  { %v277_v40 = vpop.f32.mrf.mxu1 }
  0xf7   :  { %v320_v42 = vcombine.high %v312_v39, %v312_v39  ;;  %v288_v43 = vcombine.high %v277_v40, %v277_v40  ;;  %v319_v44 = vrot.slane %v305_v38, %v180_v14  ;;  %v295_v45 = vrot.slane %v277_v40, %v180_v14  ;;  %v386_v38 = vld [vmem:[%s701_s2] sm:$0xff] }
  0xf8   :  { %v334_v54 = vadd.f32 %v312_v39, %v150_v41  ;;  %vm387_vm10 = vcmp.ne.f32.partialorder %v386_v38, 0.0 }
  0xf9   :  { %v335_v46 = vadd.f32 %v320_v42, %v150_v41  ;;  %v302_v47 = vrot.slane %v288_v43, %v180_v14  ;;  %v303_v48 = vcombine.high %v295_v45, %v295_v45  ;;  %v330_v49 = vadd.f32 %v295_v45, %v150_v41 }
  0xfa   :  { %v321_v50 = vcombine.high %v319_v44, %v319_v44  ;;  %v336_v57 = vadd.f32 %v319_v44, %v150_v41 }
  0xfb   :  { %521 = vtanh.f32 %v335_v46  ;;  %v304_v51 = vcombine.high %v302_v47, %v302_v47  ;;  %v331_v52 = vadd.f32 %v303_v48, %v150_v41  ;;  %v332_v53 = vadd.f32 %v302_v47, %v150_v41 }
  0xfc   :  { %523 = vtanh.f32 %v330_v49  ;;  %v337_v56 = vadd.f32 %v321_v50, %v150_v41 }
  0xfd   :  { %v333_v55 = vadd.f32 %v304_v51, %v150_v41  ;;  %525 = vtanh.f32 %v331_v52 }
  0xfe   :  { %527 = vtanh.f32 %v332_v53 }
  0xff   :  { %529 = vtanh.f32 %v333_v55 }
 0x100   :  { %531 = vtanh.f32 %v334_v54 }
 0x101   :  { %533 = vtanh.f32 %v337_v56 }
 0x102   :  { %535 = vtanh.f32 %v336_v57 }
 0x108   :  { %v522_v58 = vpop.eup %521 }
 0x109   :  { %v358_v60 = vmul.f32 %v522_v58, %v477_v59  ;;  %v524_v61 = vpop.eup %523 }
 0x10a   :  { %v526_v63 = vpop.eup %525  ;;  %v353_v0 = vmul.f32 %v524_v61, %v477_v59 }
 0x10b   :  { %v377_v62 = vsel %vm361_vm2, %v358_v60, 0.0  ;;  %v528_v2 = vpop.eup %527  ;;  %v354_v7 = vmul.f32 %v526_v63, %v477_v59 }
 0x10c   :  { %378 = vadd.xlane.f32.xlu1 %v377_v62  ;;  %v530_v3 = vpop.eup %529  ;;  %v362_v4 = vsel %vm361_vm2, %v353_v0, 0.0  ;;  %v355_v6 = vmul.f32 %v528_v2, %v477_v59 }
 0x10d   :  { %v532_v8 = vpop.eup %531  ;;  %363 = vadd.xlane.f32.xlu0 %v362_v4  ;;  %v356_v10 = vmul.f32 %v530_v3, %v477_v59  ;;  %v365_v12 = vsel %vm361_vm2, %v354_v7, 0.0 }
 0x10e   :  { %v368_v9 = vsel %vm361_vm2, %v355_v6, 0.0  ;;  %v534_v11 = vpop.eup %533  ;;  %v357_v13 = vmul.f32 %v532_v8, %v477_v59 }
 0x10f   :  { %v536_v14 = vpop.eup %535  ;;  %v371_v15 = vsel %vm361_vm2, %v356_v10, 0.0  ;;  %v360_v16 = vmul.f32 %v534_v11, %v477_v59 }
 0x110   :  { %369 = vadd.xlane.f32.xlu1 %v368_v9  ;;  %v374_v17 = vsel %vm361_vm2, %v357_v13, 0.0  ;;  %v359_v18 = vmul.f32 %v536_v14, %v477_v59 }
 0x111   :  { %366 = vadd.xlane.f32.xlu0 %v365_v12  ;;  %v383_v19 = vsel %vm361_vm2, %v360_v16, 0.0 }
 0x112   :  { %v380_v20 = vsel %vm361_vm2, %v359_v18, 0.0 }
 0x114   :  { %372 = vadd.xlane.f32.xlu1 %v371_v15 }
 0x115   :  { %375 = vadd.xlane.f32.xlu0 %v374_v17 }
 0x118   :  { %384 = vadd.xlane.f32.xlu1 %v383_v19 }
 0x119   :  { %381 = vadd.xlane.f32.xlu0 %v380_v20 }
 0x195   :  { %v379_v22 = vpop.xlane.xlu1 %378 }
 0x196   :  { %v364_v23 = vpop.xlane.xlu0 %363  ;;  %v421_v36 = vrot.slane %v379_v22, %v400_v24 }
 0x197   :  { %v401_v28 = vrot.slane %v364_v23, %v400_v24 }
 0x199   :  { %v370_v25 = vpop.xlane.xlu1 %369 }
 0x19a   :  { %v409_v26 = vrot.slane %v370_v25, %v400_v24  ;;  %v367_v27 = vpop.xlane.xlu0 %366 }
 0x19b   :  { %v405_v29 = vrot.slane %v367_v27, %v400_v24 }
 0x19d   :  { %v373_v30 = vpop.xlane.xlu1 %372  ;;  %v431_v31 = vsel %vm430_vm3, %v405_v29, %v401_v28 }
 0x19e   :  { %v413_v32 = vrot.slane %v373_v30, %v400_v24  ;;  %v433_v33 = vsel %vm432_vm4, %v409_v26, %v431_v31  ;;  %v376_v34 = vpop.xlane.xlu0 %375 }
 0x19f   :  { %v417_v1 = vrot.slane %v376_v34, %v400_v24 }
 0x1a0   :  { %v435_v35 = vsel %vm434_vm5, %v413_v32, %v433_v33 }
 0x1a1   :  { %v385_v37 = vpop.xlane.xlu1 %384  ;;  %v437_v5 = vsel %vm436_vm6, %v417_v1, %v435_v35 }
 0x1a2   :  { %v429_v39 = vrot.slane %v385_v37, %v400_v24  ;;  %v439_v40 = vsel %vm438_vm7, %v421_v36, %v437_v5  ;;  %v382_v41 = vpop.xlane.xlu0 %381 }
 0x1a3   :  { %v425_v42 = vrot.slane %v382_v41, %v400_v24 }
 0x1a5   :  { %v441_v43 = vsel %vm440_vm8, %v425_v42, %v439_v40 }
 0x1a6   :  { %v443_v44 = vsel %vm442_vm9, %v429_v39, %v441_v43 }
 0x1a7   :  { %v445_v45 = vsel %vm387_vm10, -1e+12, %v443_v44 }
 0x1a8   :  { %v447_v46 = vsel %vm446_vm11, %v445_v45, -inf }
 0x1a9   :  { %v448_v47 = vrot.slane %v447_v46, 4 }
 0x1ab   :  { %v449_v48 = vmax.f32 %v447_v46, %v448_v47 }
 0x1ad   :  { %v450_v49 = vrot.slane %v449_v48, 2 }
 0x1af   :  { %v451_v50 = vmax.f32 %v449_v48, %v450_v49 }
 0x1b1   :  { %v452_v51 = vrot.slane %v451_v50, 1 }
 0x1b3   :  { %v453_v52 = vmax.f32 %v451_v50, %v452_v51 }
 0x1b5   :  { %v454_v53 = vsub.f32 %v445_v45, %v453_v52 }
 0x1b7   :  { %v455_v54 = vmul.f32 1.442695, %v454_v53 }
 0x1b9   :  { %537 = vpow2.f32 %v455_v54 }
 0x1c6   :  { %v538_v55 = vpop.eup %537 }
 0x1c7   :  { %v457_v56 = vsel %vm446_vm11, %v538_v55, 0.0 }
 0x1c8   :  { %v458_v57 = vrot.slane %v457_v56, 4 }
 0x1ca   :  { %v459_v58 = vadd.f32 %v458_v57, %v457_v56 }
 0x1cc   :  { %v460_v59 = vrot.slane %v459_v58, 2 }
 0x1ce   :  { %v461_v60 = vadd.f32 %v460_v59, %v459_v58 }
 0x1d0   :  { %v462_v61 = vrot.slane %v461_v60, 1 }
 0x1d2   :  { %v463_v62 = vadd.f32 %v462_v61, %v461_v60 }
 0x1d4   :  { %539 = vrcp.f32 %v463_v62 }
 0x1e1   :  { %v540_v63 = vpop.eup %539 }
 0x1e2   :  { %v465_v0 = vmul.f32 %v540_v63, %v538_v55 }
 0x1e4   :  { %466 = vst.msk [vmem:[%s706_s7] sm:$0xff] %vm446_vm11, %v465_v0 }
 0x1e5   :  { %471 = vsyncpa [#allocation3], 1 }
 0x1e6   :  { %472 = vsyncpa [#allocation5], 1 }

</bundles_post_ra>
